<compile_context>
chip_gen: v6e
topology: v6e:2x2x1
jax: 0.10.0
libtpu: 0.0.40
codegen_flags: <defaults>
</compile_context>

<pallas_src>
import math
from functools import lru_cache

import jax
import jax.numpy as jnp
from jax.experimental import pallas as pl
from jax.experimental.pallas import tpu as pltpu

_LANE = 128
_SUBLANE = 8


def _round_up(a, b):
    return -(-a // b) * b


# --------------------------------------------------------------------------
# Kernel: fused lane-dense  out = x * scale + pe  (pure VPU, HBM-roofline).
# --------------------------------------------------------------------------
def _pe_add_kernel(x_ref, pe_ref, scale_ref, o_ref):
    # x_ref / o_ref : (B, TL) lane-dense tile of the flattened (B, S*D) input.
    # pe_ref        : (1, TL) matching slice of the cached PE table
    #                 (broadcast over the batch/sublane axis).
    # scale_ref     : (1, 1) f32 scalar in SMEM.
    # All transcendentals were hoisted out of the kernel -> single fused
    # multiply-add hidden in the DMA shadow.
    o_ref[...] = (x_ref[...] * scale_ref[0, 0] + pe_ref[...]).astype(o_ref.dtype)


# --------------------------------------------------------------------------
# Cached PE table (built once per (S, D, dtype); half-width sin/cos interleave).
# --------------------------------------------------------------------------
@lru_cache(maxsize=32)
def _pe_table_flat(S, D, dtype_name):
    pos = jnp.arange(S, dtype=jnp.float32)[:, None]                     # (S, 1)
    half = (D + 1) // 2
    # div_term = 10000 ** (-2k / D): same exponent for sin (even) and cos (odd)
    # columns, as in the Annotated-Transformer buffer.
    inv_freq = jnp.exp(jnp.arange(half, dtype=jnp.float32)
                       * (-2.0 * math.log(10000.0) / D))                # (half,)
    ang = pos * inv_freq[None, :]                                       # (S, half)
    pe = jnp.stack([jnp.sin(ang), jnp.cos(ang)], axis=-1)               # (S, half, 2)
    pe = pe.reshape(S, 2 * half)[:, :D]                                 # (S, D)
    return pe.astype(jnp.dtype(dtype_name)).reshape(1, S * D)


# --------------------------------------------------------------------------
# Tile selection with sublane-padded VMEM accounting.
# --------------------------------------------------------------------------
def _choose_lane_tile(flat, B, itemsize, vmem_budget_bytes):
    """Largest lane-dense (multiple-of-128) tile whose padded, double-buffered
    VMEM footprint (x-in + out + pe blocks) stays under budget, keeping >= 2
    grid steps whenever possible (v7x dual TensorCore / DMA overlap)."""
    rows_x = _round_up(B, _SUBLANE)          # x / out blocks pad B to 8 sublanes
    rows_pe = _SUBLANE                       # the (1, tl) PE block pads to 8 too
    # per lane-column bytes: (x-in + out) * rows_x + pe * 8, x2 double buffers
    bytes_per_lane = 2 * (2 * rows_x + rows_pe) * itemsize
    cap = max(_LANE, (vmem_budget_bytes // bytes_per_lane) // _LANE * _LANE)
    if flat <= _LANE:
        return flat, 1, bytes_per_lane * flat
    tl = min(cap, _round_up(flat, _LANE))
    tl = min(tl, _round_up(pl.cdiv(flat, 2), _LANE))   # guarantee >= 2 steps
    return tl, pl.cdiv(flat, tl), bytes_per_lane * tl


# --------------------------------------------------------------------------
# Wrapper: out = x * scale + PE[:S]   (scale=1.0 == PositionalEncoding.forward)
# --------------------------------------------------------------------------
def position_encoding(x, *, scale=1.0, vmem_budget_bytes=32 * 1024 * 1024):
    B, S, D = x.shape
    flat = S * D
    itemsize = jnp.dtype(x.dtype).itemsize

    pe2 = _pe_table_flat(S, D, jnp.dtype(x.dtype).name)       # (1, flat), cached
    x2 = x.reshape(B, flat)
    scale_arr = jnp.full((1, 1), scale, dtype=jnp.float32)

    tl, n_blocks, footprint = _choose_lane_tile(flat, B, itemsize,
                                                vmem_budget_bytes)
    # Explicit scoped-VMEM limit derived from the padded footprint (safe under
    # v7x's 64 MiB physical VMEM, overrides v5e's small 16 MiB default).
    vmem_limit = int(min(48 * 1024 * 1024,
                         max(16 * 1024 * 1024, footprint + (4 << 20))))

    out2 = pl.pallas_call(
        _pe_add_kernel,
        out_shape=jax.ShapeDtypeStruct((B, flat), x.dtype),
        grid_spec=pltpu.PrefetchScalarGridSpec(
            num_scalar_prefetch=0,
            grid=(n_blocks,),
            in_specs=[
                pl.BlockSpec((B, tl), lambda i: (0, i)),            # x tile
                pl.BlockSpec((1, tl), lambda i: (0, i)),            # PE slice
                pl.BlockSpec(memory_space=pltpu.MemorySpace.SMEM),  # scale
            ],
            out_specs=pl.BlockSpec((B, tl), lambda i: (0, i)),
        ),
        compiler_params=pltpu.CompilerParams(
            dimension_semantics=("parallel",),
            vmem_limit_bytes=vmem_limit,
        ),
        # In-place add: output aliases x (no extra HBM buffer when donated).
        input_output_aliases={0: 0},
    )(x2, pe2, scale_arr)
    return out2.reshape(B, S, D)


# --------------------------------------------------------------------------
# Pure-JAX reference, built the way PyTorch builds the buffer (even/odd scatter).
# --------------------------------------------------------------------------
def _reference(x):
    B, S, D = x.shape
    position = jnp.arange(S, dtype=jnp.float32)[:, None]
    div_term = jnp.exp(jnp.arange(0, D, 2, dtype=jnp.float32)
                       * (-math.log(10000.0) / D))
    pe = jnp.zeros((S, D), dtype=jnp.float32)
    pe = pe.at[:, 0::2].set(jnp.sin(position * div_term))
    pe = pe.at[:, 1::2].set(jnp.cos(position * div_term))
    return x + pe[None].astype(x.dtype)


if __name__ == "__main__":
    key = jax.random.PRNGKey(0)
    B, S_src, S_tgt, D = 2, 8, 8, 32
    k1, k2, k3, k4 = jax.random.split(key, 4)
    source = jax.random.normal(k1, (B, S_src, D), dtype=jnp.float32)
    target = jax.random.normal(k2, (B, S_tgt, D), dtype=jnp.float32)

    # src_embed(source) / tgt_embed(target) stages of EncoderDecoder.forward
    # (PositionalEncoding, eval mode -> dropout is identity).
    src_emb = jax.block_until_ready(position_encoding(source))
    tgt_emb = jax.block_until_ready(position_encoding(target))
    assert src_emb.shape == (B, S_src, D) and src_emb.dtype == jnp.float32
    assert tgt_emb.shape == (B, S_tgt, D) and tgt_emb.dtype == jnp.float32
    assert jnp.allclose(src_emb, _reference(source), atol=1e-5, rtol=1e-5)
    assert jnp.allclose(tgt_emb, _reference(target), atol=1e-5, rtol=1e-5)

    # Fused sqrt(d_model) scaling (Embeddings * sqrt(D) + PE in one HBM pass).
    scaled = jax.block_until_ready(position_encoding(source, scale=math.sqrt(D)))
    assert jnp.allclose(scaled, _reference(source * math.sqrt(D)),
                        atol=1e-4, rtol=1e-5)

    # Sublane-full batch (B >= 8) with a multi-step lane-dense grid.
    x_big = jax.random.normal(k3, (16, 16, 64), dtype=jnp.float32)
    out_big = jax.block_until_ready(position_encoding(x_big))
    assert jnp.allclose(out_big, _reference(x_big), atol=1e-5, rtol=1e-5)

    # Ragged path (S*D % 128 != 0): masked last block instead of a giant
    # single-block fallback.
    x_rag = jax.random.normal(k4, (2, 10, 24), dtype=jnp.float32)
    out_rag = jax.block_until_ready(position_encoding(x_rag))
    assert jnp.allclose(out_rag, _reference(x_rag), atol=1e-5, rtol=1e-5)

    print("KERNEL_OK")
</pallas_src>

<mosaic_0001>
module attributes {stable_mosaic.version = 11 : i64} {
  func.func @_pe_add_kernel(%arg0: i32, %arg1: memref<2x128xf32, #tpu.memory_space<vmem>>, %arg2: memref<1x128xf32, #tpu.memory_space<vmem>>, %arg3: memref<1x1xf32, #tpu.memory_space<smem>>, %arg4: memref<2x128xf32, #tpu.memory_space<vmem>>) attributes {dimension_semantics = [#tpu.dimension_semantics<parallel>], iteration_bounds = array<i64: 2>, scalar_prefetch = 0 : i64, scratch_operands = 0 : i64, tpu.core_type = #tpu.core_type<tc>, window_params = [{transform_indices = @transform_0, window_bounds = array<i64: 2, 128>}, {transform_indices = @transform_1, window_bounds = array<i64: 1, 128>}, {transform_indices = @transform_2, window_bounds = array<i64: 1, 1>}, {transform_indices = @transform_3, window_bounds = array<i64: 2, 128>}]} {
    %c0 = arith.constant 0 : index
    %c0_0 = arith.constant 0 : index
    %0 = vector.load %arg1[%c0, %c0_0] : memref<2x128xf32, #tpu.memory_space<vmem>>, vector<2x128xf32>
    %c0_1 = arith.constant 0 : index
    %c0_2 = arith.constant 0 : index
    %1 = memref.load %arg3[%c0_1, %c0_2] : memref<1x1xf32, #tpu.memory_space<smem>>
    %2 = vector.broadcast %1 : f32 to vector<2x128xf32>
    %3 = arith.mulf %0, %2 : vector<2x128xf32>
    %c0_3 = arith.constant 0 : index
    %c0_4 = arith.constant 0 : index
    %4 = vector.load %arg2[%c0_3, %c0_4] : memref<1x128xf32, #tpu.memory_space<vmem>>, vector<1x128xf32>
    %5 = vector.broadcast %4 : vector<1x128xf32> to vector<2x128xf32>
    %6 = arith.addf %3, %5 : vector<2x128xf32>
    %c0_5 = arith.constant 0 : index
    %c0_6 = arith.constant 0 : index
    %7 = vector.load %arg4[%c0_5, %c0_6] : memref<2x128xf32, #tpu.memory_space<vmem>>, vector<2x128xf32>
    tpu.vector_store %arg4[%c0_5, %c0_6], %6 {strides = array<i32>} : memref<2x128xf32, #tpu.memory_space<vmem>>, vector<2x128xf32>,
    return
  }
  func.func @transform_0(%arg0: i32) -> (i32, i32) {
    %c0_i32 = arith.constant 0 : i32
    %c0_i32_0 = arith.constant 0 : i32
    return %c0_i32, %arg0 : i32, i32
  }
  func.func @transform_1(%arg0: i32) -> (i32, i32) {
    %c0_i32 = arith.constant 0 : i32
    %c0_i32_0 = arith.constant 0 : i32
    return %c0_i32, %arg0 : i32, i32
  }
  func.func @transform_2(%arg0: i32) -> (i32, i32) {
    %c0_i32 = arith.constant 0 : i32
    %c0_i32_0 = arith.constant 0 : i32
    %c0_i32_1 = arith.constant 0 : i32
    return %c0_i32, %c0_i32_0 : i32, i32
  }
  func.func @transform_3(%arg0: i32) -> (i32, i32) {
    %c0_i32 = arith.constant 0 : i32
    %c0_i32_0 = arith.constant 0 : i32
    return %c0_i32, %arg0 : i32, i32
  }
}

</mosaic_0001>

<bundles_post_ra>
// kernel: tpu_custom_call.1
= control target key start
LH: loop header
LB: loop body
LE: loop exit
PB: predicated region body
PF: predicated region fallthrough
CT: control target
= control target key end

     0   :  { %s637_s0 = inlined_call_operand.hbm [shape: f32[2,256], index: 0, kind: input, shape index: {}, may-alias: {0,3}]   ;;  %s638_s1 = inlined_call_operand.vmem [shape: f32[1,256], index: 1, kind: input, shape index: {}]   ;;  %s639_s2 = inlined_call_operand.<no memory space> [shape: f32[1,1], index: 2, kind: input, shape index: {}]   ;;  %s640_s3 = inlined_call_operand.hbm [shape: f32[2,256], index: 3, kind: output, shape index: {}, may-alias: {0,3}]  }
   0x1   :  { %8 = sst [smem:[#allocation2]] %s639_s2 }
   0x2   :  { %9 = vsyncpa [#allocation4], 0 }
   0x3   :  { %11 = vsyncpa [#allocation4 + $0x1], 0 }
   0x4   :  { %12 = vsyncpa [#allocation5], 0 }
   0x5   :  { %14 = vsyncpa [#allocation5 + $0x1], 0  ;;  %s485_s14 = smov 0   ;;  %s487_s15 = smov 0  }
   0x6   :  { %s489_s16 = smov 0   ;;  %s491_s17 = smov 0  }
   0x7 LB: > { %s506_s2 = sadd.s32 4294967295, %s458_s17   ;;  %s307_s18 = sadd.s32 4294967294, %s458_s17   ;;  %s458_s17 = sphi %s491_s17, %s657_s17   ;;  %s454_s16 = sphi %s489_s16, %s656_s16   ;;  %s450_s15 = sphi %s487_s15, %s655_s15   ;;  %s446_s14 = sphi %s485_s14, %s654_s14  }
   0x8   : > { %s510_s19 = sadd.s32 1, %s458_s17   ;;  %s27_s20 = sadd.s32 1, %s454_s16 }
   0x9   : > { %s24_s21 = ssub.s32 %s458_s17, %s510_s19  ;;  %p34_p0 = scmp.ne.s32.totalorder %s454_s16, %s450_s15 }
   0xa   : > { %p25_p1 = scmp.eq.s32.totalorder %s24_s21, 0  ;;  %p35_p2 = scmp.eq.s32.totalorder %s458_s17, 0 }
   0xb   : > { %p40_p3 = scmp.ne.s32.totalorder %s450_s15, %s446_s14  ;;  %p41_p4 = scmp.eq.s32.totalorder %s506_s2, 0 }
   0xc   : > { %s522_s22 = scalar_select %p25_p1, %s454_s16, %s27_s20  }
   0xd   : > { %p524_p5 = por %p35_p2, %p34_p0  ;;  %p528_p6 = por %p41_p4, %p40_p3 }
   0xe   : > { %p111_p7 = scmp.eq.s32.totalorder %s506_s2, 1  ;;  %p117_p8 = scmp.eq.s32.totalorder %s307_s18, 1 }
   0xf   : > { %s644_s24 = scalar_select %p528_p6, 1, 0 }
  0x10   : > { %p332_p10 = scmp.lt.s32.totalorder %s458_s17, 2  ;;  %p535_p11 = por %p111_p7, %p34_p0 }
  0x11   : > { %p539_p12 = por %p117_p8, %p40_p3  ;;  %s140_s27 = sand.u32 1, %s454_s16  }
  0x12   : > { %s645_s25 = scalar_select %p535_p11, 1, 0 }
  0x13   : > { %s646_s26 = scalar_select %p539_p12, 1, 0 }
  0x14   : > { %s311_s28 = sshll.u32 %s458_s17, 5  ;;  %s310_s29 = sshll.u32 %s140_s27, 1 }
  0x15   : > { %s548_s5 = scalar_lea.hbm %s637_s0, %s311_s28  ;;  %s144_s6 = scalar_lea.vmem [#allocation3], %s310_s29 }
  0x16   : > { %s151_s7 = sshll.u32 %s144_s6, 4  ;;  %p552_p13 = pnand %p332_p10, %p524_p5  ;;  %s556_s7 = int_to_ptr.vmem [resolvable:$true] %s151_s7 }
  0x17   : > { %s141_s9 = scalar_lea.sflag [#allocation4], %s140_s27  ;;  %s366_s10 = scalar_lea.hbm %s548_s5, 32 }
  0x18   : > { %p367_p2 = scmp.ne.s32.totalorder %s548_s5, %s366_s10  ;;  %p368_p3 = pneg %p552_p13 }
  0x19   : > { %s371_s13 = scalar_lea.hbm %s637_s0, 64  ;;  %p372_p5 = scmp.lt.s32.totalorder %s548_s5, %s637_s0 }
  0x1a   : > { %p369_p4 = pnand %p368_p3, %p367_p2  ;;  %p373_p8 = scmp.lt.s32.totalorder %s371_s13, %s366_s10 }
  0x1c   : > { %p370_p7 = pneg %p369_p4  ;;  %p374_p10 = por %p373_p8, %p372_p5 }
  0x1e   : > { %p375_p9 = pnand %p374_p10, %p370_p7 }
  0x20   : > { %378 = shalt.err (!%p375_p9)
}
  0x21   : > { %s379_s21 = scalar_lea.vmem %s556_s7, 32  ;;  %s460_s23 = smov [#allocation3]  }
  0x22   : > { %p380_p0 = scmp.ne.s32.totalorder %s556_s7, %s379_s21  ;;  %s384_s27 = sshll.u32 %s460_s23, 4  ;;  %s385_s27 = int_to_ptr.vmem [resolvable:$false] %s384_s27 }
  0x23   : > { %s386_s28 = scalar_lea.vmem %s385_s27, 64  ;;  %p387_p4 = scmp.lt.s32.totalorder %s556_s7, %s385_s27 }
  0x24   : > { %p382_p1 = pnand %p380_p0, %p368_p3  ;;  %p388_p12 = scmp.lt.s32.totalorder %s386_s28, %s379_s21 }
  0x26   : > { %p383_p2 = pneg %p382_p1  ;;  %p389_p11 = por %p388_p12, %p387_p4 }
  0x28   : > { %p390_p6 = pnand %p389_p11, %p383_p2 }
  0x2a   : > { %393 = shalt.err (!%p390_p6)
}
  0x2b   : > { %327 = dma.hbm_to_vmem [thread:$0]  (!%p552_p13), %s548_s5, 32, %s556_s7, %s141_s9  }
  0x2c   : > { %p648_p9 = scmp.lt.s32.totalorder %s458_s17, 3  ;;  %p649_p7 = scmp.ge.s32.totalorder %s458_s17, 1 }
  0x2e   : > { %p163_p0 = pnand %p649_p7, %p648_p9 }
  0x2f   : > { %s583_s29 = sand.u32 (!%p163_p0), 1, %s450_s15   ;;  %p650_p6 = scmp.ne.s32.totalorder (!%p163_p0), %s644_s24, 0 }
  0x30   : > { %166 = sbr.rel (%p163_p0) target bundleno = 81 (0x51), region = 32  ;;  %s313_s30 = sshll.u32 (!%p163_p0), %s583_s29, 1 }
  0x31   : > { %s169_s4 = scalar_lea.sflag (!%p163_p0), [#allocation4], %s583_s29  ;;  %s172_s6 = scalar_lea.vmem (!%p163_p0), [#allocation3], %s313_s30 }
  0x35   : > { %437 = dma.done.wait (%p650_p6), %s169_s4, 32  }
  0x36   : > { %439 = vsyncadd (%p650_p6), %s169_s4, 4294967264  ;;  %p198_p11 = scmp.lt.s32.totalorder %s506_s2, 1  ;;  %s202_s5 = sld [smem:[#allocation2]]  ;;  %v201_v0 = vld [vmem:[%s172_s6] sm:$0x3] }
  0x37   : > { %s197_s11 = scalar_lea.vmem [#allocation6], %s313_s30  ;;  %s317_s13 = sshll.u32 %s506_s2, 5 }
  0x38   : > { %s199_s7 = scalar_select %p198_p11, %s506_s2, 1 }
  0x39   : > { %s228_s12 = sshll.u32 %s197_s11, 4  ;;  %s226_s20 = scalar_lea.hbm %s640_s3, %s317_s13  ;;  %s597_s12 = int_to_ptr.vmem [resolvable:$true] %s228_s12 }
  0x3a   : > { %s200_s10 = scalar_lea.vmem %s638_s1, %s199_s7  ;;  %s215_s21 = scalar_lea.sflag [#allocation5], %s583_s29 }
  0x3b   : > { %v315_v2 = vld [vmem:[%s200_s10] ss:$0 sm:$0xff]  ;;  %s394_s23 = scalar_lea.vmem %s597_s12, 32  ;;  %p651_p13 = scmp.ne.s32.totalorder %s645_s25, 0 }
  0x3c   : > { %v203_v1 = vstv %s202_s5  ;;  %p395_p12 = scmp.ne.s32.totalorder %s597_s12, %s394_s23  ;;  %s461_s27 = smov [#allocation6]  }
  0x3d   : > { %v204_v3 = vmul.f32 %v203_v1, %v201_v0  ;;  %s398_s2 = sshll.u32 %s461_s27, 4  ;;  %s399_s2 = int_to_ptr.vmem [resolvable:$false] %s398_s2 }
  0x3e   : > { %p396_p1 = pnand %p395_p12, %p651_p13  ;;  %s400_s28 = scalar_lea.vmem %s399_s2, 64 }
  0x3f   : > { %v212_v4 = vadd.f32 %v315_v2, %v204_v3  ;;  %p401_p5 = scmp.lt.s32.totalorder %s597_s12, %s399_s2  ;;  %p402_p8 = scmp.lt.s32.totalorder %s400_s28, %s394_s23 }
  0x40   : > { %p397_p3 = pneg %p396_p1 }
  0x41   : > { %213 = vst [vmem:[%s197_s11] sm:$0x3] %v212_v4  ;;  %p403_p10 = por %p402_p8, %p401_p5 }
  0x43   : > { %p404_p2 = pnand %p403_p10, %p397_p3 }
  0x45   : > { %407 = shalt.err (!%p404_p2)
}
  0x46   : > { %s408_s30 = scalar_lea.hbm %s226_s20, 32  ;;  %s412_s6 = scalar_lea.hbm %s640_s3, 64 }
  0x47   : > { %p409_p4 = scmp.ne.s32.totalorder %s226_s20, %s408_s30  ;;  %p413_p0 = scmp.lt.s32.totalorder %s226_s20, %s640_s3 }
  0x48   : > { %p414_p6 = scmp.lt.s32.totalorder %s412_s6, %s408_s30 }
  0x49   : > { %p410_p9 = pnand %p409_p4, %p651_p13 }
  0x4a   : > { %p415_p11 = por %p414_p6, %p413_p0 }
  0x4b   : > { %p411_p7 = pneg %p410_p9 }
  0x4d   : > { %p416_p12 = pnand %p415_p11, %p411_p7 }
  0x4f   : > { %419 = shalt.err (!%p416_p12)
}
  0x50   : > { %322 = dma.vmem_to_hbm [thread:$0]  (%p651_p13), %s597_s12, 32, %s226_s20, %s215_s21  }
  0x51 PF: > { %s240_s8 = sand.u32 1, %s446_s14   ;;  %p652_p1 = scmp.ne.s32.totalorder %s646_s26, 0 }
  0x52   : > { %p653_p3 = scmp.ge.s32.totalorder %s458_s17, 2  ;;  %s241_s9 = scalar_lea.sflag [#allocation5], %s240_s8 }
  0x54   : > { %p329_p5 = pnand %p653_p3, %p652_p1 }
  0x56   : > { %p330_p8 = pneg %p329_p5 }
  0x58   : > { %441 = dma.done.wait (%p330_p8), %s241_s9, 32  }
  0x59   : > { %443 = vsyncadd (%p330_p8), %s241_s9, 4294967264  ;;  %p17_p10 = scmp.ge.s32.totalorder %s510_s19, 4   ;;  %s654_s14 = smov %s450_s15 }
  0x5a   : > { %s655_s15 = smov %s454_s16  ;;  %s656_s16 = smov %s522_s22 }
  0x5b   : > { %s657_s17 = smov %s510_s19  ;;  %19 = sbr.rel (!%p17_p10) target bundleno = 7 (0x7), region = 80 }
  0x60   :  { %246 = vsyncpa [#allocation4], 1 }
  0x61   :  { %248 = vsyncpa [#allocation4 + $0x1], 1 }
  0x62   :  { %249 = vsyncpa [#allocation5], 1 }
  0x63   :  { %251 = vsyncpa [#allocation5 + $0x1], 1 }

</bundles_post_ra>
